<compile_context>
chip_gen: v7x
topology: tpu7x:2x2x1
jax: 0.10.0
libtpu: 0.0.40
codegen_flags: <defaults>
</compile_context>

<pallas_src>
import jax
import jax.numpy as jnp
from jax.experimental import pallas as pl
from jax.experimental.pallas import tpu as pltpu

N = 12
SPIKE_THRESHOLD = 30.0

# rows of the packed parameter block
_ROW_E_L, _ROW_INV_TAU_M, _ROW_R_I, _ROW_INV_TAU_G, _ROW_V0, _ROW_G0 = range(6)


def _lif_rollout_kernel(x_ref, params_ref, w_ref,
                        spiked_ref, v_out_ref, g_out_ref,
                        v_sc, g_sc):
    t = pl.program_id(0)

    # initialize carried state from packed params on the first step
    @pl.when(t == 0)
    def _():
        v_sc[...] = params_ref[_ROW_V0:_ROW_V0 + 1, :]
        g_sc[...] = params_ref[_ROW_G0:_ROW_G0 + 1, :]

    e_l = params_ref[_ROW_E_L:_ROW_E_L + 1, :]
    inv_tau_m = params_ref[_ROW_INV_TAU_M:_ROW_INV_TAU_M + 1, :]
    r_i = params_ref[_ROW_R_I:_ROW_R_I + 1, :]
    inv_tau_g = params_ref[_ROW_INV_TAU_G:_ROW_INV_TAU_G + 1, :]

    v = v_sc[...]                      # (1, N)
    g = g_sc[...]                      # (1, N)
    x = x_ref[0]                       # (1, N) slice of the (1,1,N) block

    # I = g @ (mask * w) + 0.9 * x_in   (w_eff precomputed in the wrapper)
    I = jnp.dot(g, w_ref[...], preferred_element_type=jnp.float32) + 0.9 * x

    # dv = (E_L - v + I * R_I) / tau_m ; v_next = v + dv
    v_next = v + (e_l - v + I * r_i) * inv_tau_m

    # soft spike (module output), hard spike (state update)
    spiked_soft = jax.nn.sigmoid(v_next - SPIKE_THRESHOLD)
    spiked = (v_next >= SPIKE_THRESHOLD).astype(jnp.float32)
    not_spiked = 1.0 - spiked

    # membrane reset to E_L on spike; conductance decay or set to 1 on spike
    v_new = spiked * e_l + not_spiked * v_next
    g_new = spiked + not_spiked * (g - g * inv_tau_g)

    v_sc[...] = v_new
    g_sc[...] = g_new

    spiked_ref[0] = spiked_soft        # per-step output
    v_out_ref[...] = v_new             # resident; final value survives
    g_out_ref[...] = g_new


def lif_unbounded_rollout(x_seq, v0, g0, w, mask, e_l, tau_m, r_i, tau_g):
    """Run T LIF timesteps in one kernel.

    x_seq: (T, N) external input; v0, g0, e_l, tau_m, r_i, tau_g: (N,);
    w, mask: (N, N).  Returns (spiked_soft (T,N), v_final (N,), g_final (N,)).
    """
    f32 = jnp.float32
    T, n = x_seq.shape

    # hoisted constants (per-call, not per-step)
    w_eff = (mask.astype(f32) * w.astype(f32))
    params = jnp.zeros((8, n), f32)
    params = params.at[_ROW_E_L].set(e_l.astype(f32))
    params = params.at[_ROW_INV_TAU_M].set(1.0 / tau_m.astype(f32))
    params = params.at[_ROW_R_I].set(r_i.astype(f32))
    params = params.at[_ROW_INV_TAU_G].set(1.0 / tau_g.astype(f32))
    params = params.at[_ROW_V0].set(v0.astype(f32))
    params = params.at[_ROW_G0].set(g0.astype(f32))

    x3 = x_seq.astype(f32).reshape(T, 1, n)

    step_spec = pl.BlockSpec((1, 1, n), lambda t: (t, 0, 0))
    const_vec_spec = pl.BlockSpec((1, n), lambda t: (0, 0))

    out_shapes = (
        jax.ShapeDtypeStruct((T, 1, n), f32),   # soft spikes per step
        jax.ShapeDtypeStruct((1, n), f32),      # final v
        jax.ShapeDtypeStruct((1, n), f32),      # final g
    )

    spiked, v_f, g_f = pl.pallas_call(
        _lif_rollout_kernel,
        out_shape=out_shapes,
        grid=(T,),
        in_specs=[
            step_spec,                               # x_in, streamed per step
            pl.BlockSpec((8, n), lambda t: (0, 0)),  # packed params (constant)
            pl.BlockSpec((n, n), lambda t: (0, 0)),  # w_eff (constant, MXU RHS)
        ],
        out_specs=(step_spec, const_vec_spec, const_vec_spec),
        scratch_shapes=[pltpu.VMEM((1, n), f32),     # v carry
                        pltpu.VMEM((1, n), f32)],    # g carry
        compiler_params=pltpu.CompilerParams(
            dimension_semantics=("arbitrary",)),     # time is sequential
    )(x3, params, w_eff)

    return spiked.reshape(T, n), v_f.reshape(n), g_f.reshape(n)


def init_params(key, n=N, w_mean=0.3, w_var=0.2):
    """Deterministic synthetic init matching LIF_unbounded.__init__ semantics."""
    neuron_types = jnp.array([1, 1, 1, 1, 1, 1, 1, 1, -1, -1, -1, -1], jnp.float32)
    k_w, k_el, k_tm, k_ri, k_tg = jax.random.split(key, 5)

    # weights: U(w_mean - w_var, w_mean + w_var), sign fixed per-row by type
    rand_ws = w_mean - w_var + 2.0 * w_var * jax.random.uniform(k_w, (n, n), jnp.float32)
    rand_ws = jnp.abs(rand_ws) * neuron_types[:, None]

    e_l = jax.random.uniform(k_el, (n,), jnp.float32, -55.0, -45.0)
    tau_m = jax.random.uniform(k_tm, (n,), jnp.float32, 1.3, 2.3)
    r_i = jax.random.uniform(k_ri, (n,), jnp.float32, 135.0, 140.0)
    tau_g = jax.random.uniform(k_tg, (n,), jnp.float32, 2.0, 3.5)

    r_i = jnp.clip(r_i, 100.0, 155.0)
    e_l = jnp.clip(e_l, -80.0, -35.0)
    tau_m = jnp.clip(tau_m, 1.1, 3.0)
    tau_g = jnp.clip(tau_g, 1.5, 3.5)

    mask = jnp.ones((n, n), jnp.float32) - jnp.eye(n, dtype=jnp.float32)

    v0 = e_l * jnp.ones((n,), jnp.float32)
    g0 = jnp.zeros((n,), jnp.float32)

    return rand_ws, mask, e_l, tau_m, r_i, tau_g, v0, g0


def _reference_rollout(x_seq, v0, g0, w, mask, e_l, tau_m, r_i, tau_g):
    """Pure-JAX transcription of LIF_unbounded.forward run for T steps."""
    w_eff = mask * w

    def step(carry, x):
        v, g = carry
        I = g @ w_eff + 0.9 * x
        dv = (e_l - v + I * r_i) / tau_m
        v_next = v + dv
        spiked_soft = jax.nn.sigmoid(v_next - SPIKE_THRESHOLD)
        spiked = (v_next >= SPIKE_THRESHOLD).astype(jnp.float32)
        not_spiked = (spiked - 1.0) / -1.0
        v_new = spiked * e_l + not_spiked * v_next
        g_new = spiked + not_spiked * (g - g / tau_g)
        return (v_new, g_new), spiked_soft

    (v_f, g_f), spk = jax.lax.scan(step, (v0, g0), x_seq)
    return spk, v_f, g_f


if __name__ == "__main__":
    T = 8
    key = jax.random.PRNGKey(0)
    k_init, k_x = jax.random.split(key)

    w, mask, e_l, tau_m, r_i, tau_g, v0, g0 = init_params(k_init)

    # external input current for T timesteps, shape (T, N)
    x_seq = jax.random.normal(k_x, (T, N), jnp.float32)

    spiked, v_f, g_f = lif_unbounded_rollout(
        x_seq, v0, g0, w, mask, e_l, tau_m, r_i, tau_g)
    jax.block_until_ready((spiked, v_f, g_f))

    # correctness check against pure-JAX reference of the PyTorch forward
    ref_spk, ref_v, ref_g = _reference_rollout(
        x_seq, v0, g0, w, mask, e_l, tau_m, r_i, tau_g)
    assert jnp.allclose(spiked, ref_spk, atol=1e-4, rtol=1e-4), "spiked mismatch"
    assert jnp.allclose(v_f, ref_v, atol=2e-3, rtol=1e-4), "v mismatch"
    assert jnp.allclose(g_f, ref_g, atol=1e-4, rtol=1e-4), "g mismatch"

    print("KERNEL_OK")
</pallas_src>

<mosaic_0001>
module attributes {stable_mosaic.version = 11 : i64} {
  func.func @_lif_rollout_kernel(%arg0: i32, %arg1: memref<1x1x12xf32, #tpu.memory_space<vmem>>, %arg2: memref<8x12xf32, #tpu.memory_space<vmem>>, %arg3: memref<12x12xf32, #tpu.memory_space<vmem>>, %arg4: memref<1x1x12xf32, #tpu.memory_space<vmem>>, %arg5: memref<1x12xf32, #tpu.memory_space<vmem>>, %arg6: memref<1x12xf32, #tpu.memory_space<vmem>>, %arg7: memref<1x12xf32, #tpu.memory_space<vmem>>, %arg8: memref<1x12xf32, #tpu.memory_space<vmem>>) attributes {dimension_semantics = [#tpu.dimension_semantics<arbitrary>], iteration_bounds = array<i64: 8>, scalar_prefetch = 0 : i64, scratch_operands = 2 : i64, tpu.core_type = #tpu.core_type<tc>, window_params = [{transform_indices = @transform_0, window_bounds = array<i64: 1, 1, 12>}, {pipeline_mode = #tpu.pipeline_mode<synchronous>, transform_indices = @transform_1, window_bounds = array<i64: 8, 12>}, {pipeline_mode = #tpu.pipeline_mode<synchronous>, transform_indices = @transform_2, window_bounds = array<i64: 12, 12>}, {transform_indices = @transform_3, window_bounds = array<i64: 1, 1, 12>}, {pipeline_mode = #tpu.pipeline_mode<synchronous>, transform_indices = @transform_4, window_bounds = array<i64: 1, 12>}, {pipeline_mode = #tpu.pipeline_mode<synchronous>, transform_indices = @transform_5, window_bounds = array<i64: 1, 12>}]} {
    %c0_i32 = arith.constant 0 : i32
    %0 = arith.cmpi eq, %arg0, %c0_i32 : i32
    %1 = arith.extui %0 : i1 to i32
    %c0_i32_0 = arith.constant 0 : i32
    %2 = arith.cmpi ne, %1, %c0_i32_0 : i32
    scf.if %2 {
      %c4 = arith.constant 4 : index
      %c0_30 = arith.constant 0 : index
      %48 = vector.load %arg2[%c4, %c0_30] : memref<8x12xf32, #tpu.memory_space<vmem>>, vector<1x12xf32>
      %c0_31 = arith.constant 0 : index
      %c0_32 = arith.constant 0 : index
      %49 = vector.load %arg7[%c0_31, %c0_32] : memref<1x12xf32, #tpu.memory_space<vmem>>, vector<1x12xf32>
      tpu.vector_store %arg7[%c0_31, %c0_32], %48 {strides = array<i32>} : memref<1x12xf32, #tpu.memory_space<vmem>>, vector<1x12xf32>,
      %c5 = arith.constant 5 : index
      %c0_33 = arith.constant 0 : index
      %50 = vector.load %arg2[%c5, %c0_33] : memref<8x12xf32, #tpu.memory_space<vmem>>, vector<1x12xf32>
      %c0_34 = arith.constant 0 : index
      %c0_35 = arith.constant 0 : index
      %51 = vector.load %arg8[%c0_34, %c0_35] : memref<1x12xf32, #tpu.memory_space<vmem>>, vector<1x12xf32>
      tpu.vector_store %arg8[%c0_34, %c0_35], %50 {strides = array<i32>} : memref<1x12xf32, #tpu.memory_space<vmem>>, vector<1x12xf32>,
    } else {
    }
    %c0 = arith.constant 0 : index
    %c0_1 = arith.constant 0 : index
    %3 = vector.load %arg2[%c0, %c0_1] : memref<8x12xf32, #tpu.memory_space<vmem>>, vector<1x12xf32>
    %c1 = arith.constant 1 : index
    %c0_2 = arith.constant 0 : index
    %4 = vector.load %arg2[%c1, %c0_2] : memref<8x12xf32, #tpu.memory_space<vmem>>, vector<1x12xf32>
    %c2 = arith.constant 2 : index
    %c0_3 = arith.constant 0 : index
    %5 = vector.load %arg2[%c2, %c0_3] : memref<8x12xf32, #tpu.memory_space<vmem>>, vector<1x12xf32>
    %c3 = arith.constant 3 : index
    %c0_4 = arith.constant 0 : index
    %6 = vector.load %arg2[%c3, %c0_4] : memref<8x12xf32, #tpu.memory_space<vmem>>, vector<1x12xf32>
    %c0_5 = arith.constant 0 : index
    %c0_6 = arith.constant 0 : index
    %7 = vector.load %arg7[%c0_5, %c0_6] : memref<1x12xf32, #tpu.memory_space<vmem>>, vector<1x12xf32>
    %c0_7 = arith.constant 0 : index
    %c0_8 = arith.constant 0 : index
    %8 = vector.load %arg8[%c0_7, %c0_8] : memref<1x12xf32, #tpu.memory_space<vmem>>, vector<1x12xf32>
    %c0_9 = arith.constant 0 : index
    %c0_10 = arith.constant 0 : index
    %c0_11 = arith.constant 0 : index
    %9 = vector.load %arg1[%c0_9, %c0_10, %c0_11] : memref<1x1x12xf32, #tpu.memory_space<vmem>>, vector<1x1x12xf32>
    %10 = vector.shape_cast %9 : vector<1x1x12xf32> to vector<1x12xf32>
    %c0_12 = arith.constant 0 : index
    %c0_13 = arith.constant 0 : index
    %11 = vector.load %arg3[%c0_12, %c0_13] : memref<12x12xf32, #tpu.memory_space<vmem>>, vector<12x12xf32>
    %cst = arith.constant dense<0.000000e+00> : vector<1x12xf32>
    %12 = tpu.matmul %8, %11, %cst {dimension_numbers = #tpu.dot_dimension_numbers<[1], [0], [0], [1], [0, 0, 1, 1], [], []>} : vector<1x12xf32>, vector<12x12xf32>, vector<1x12xf32> -> vector<1x12xf32>
    %cst_14 = arith.constant 0.899999976 : f32
    %13 = vector.broadcast %cst_14 : f32 to vector<1x12xf32>
    %14 = arith.mulf %13, %10 : vector<1x12xf32>
    %15 = arith.addf %12, %14 : vector<1x12xf32>
    %16 = arith.subf %3, %7 : vector<1x12xf32>
    %17 = arith.mulf %15, %5 : vector<1x12xf32>
    %18 = arith.addf %16, %17 : vector<1x12xf32>
    %19 = arith.mulf %18, %4 : vector<1x12xf32>
    %20 = arith.addf %7, %19 : vector<1x12xf32>
    %cst_15 = arith.constant 3.000000e+01 : f32
    %21 = vector.broadcast %cst_15 : f32 to vector<1x12xf32>
    %22 = arith.subf %20, %21 : vector<1x12xf32>
    %23 = arith.negf %22 : vector<1x12xf32>
    %24 = math.exp %23 : vector<1x12xf32>
    %cst_16 = arith.constant 1.000000e+00 : f32
    %25 = vector.broadcast %cst_16 : f32 to vector<1x12xf32>
    %26 = arith.addf %25, %24 : vector<1x12xf32>
    %27 = arith.divf %25, %26 : vector<1x12xf32>
    %cst_17 = arith.constant 3.000000e+01 : f32
    %28 = vector.broadcast %cst_17 : f32 to vector<1x12xf32>
    %29 = arith.cmpf oge, %20, %28 : vector<1x12xf32>
    %30 = arith.extui %29 : vector<1x12xi1> to vector<1x12xi32>
    %31 = arith.sitofp %30 : vector<1x12xi32> to vector<1x12xf32>
    %cst_18 = arith.constant 1.000000e+00 : f32
    %32 = vector.broadcast %cst_18 : f32 to vector<1x12xf32>
    %33 = arith.subf %32, %31 : vector<1x12xf32>
    %34 = arith.mulf %31, %3 : vector<1x12xf32>
    %35 = arith.mulf %33, %20 : vector<1x12xf32>
    %36 = arith.addf %34, %35 : vector<1x12xf32>
    %37 = arith.mulf %8, %6 : vector<1x12xf32>
    %38 = arith.subf %8, %37 : vector<1x12xf32>
    %39 = arith.mulf %33, %38 : vector<1x12xf32>
    %40 = arith.addf %31, %39 : vector<1x12xf32>
    %c0_19 = arith.constant 0 : index
    %c0_20 = arith.constant 0 : index
    %41 = vector.load %arg7[%c0_19, %c0_20] : memref<1x12xf32, #tpu.memory_space<vmem>>, vector<1x12xf32>
    tpu.vector_store %arg7[%c0_19, %c0_20], %36 {strides = array<i32>} : memref<1x12xf32, #tpu.memory_space<vmem>>, vector<1x12xf32>,
    %c0_21 = arith.constant 0 : index
    %c0_22 = arith.constant 0 : index
    %42 = vector.load %arg8[%c0_21, %c0_22] : memref<1x12xf32, #tpu.memory_space<vmem>>, vector<1x12xf32>
    tpu.vector_store %arg8[%c0_21, %c0_22], %40 {strides = array<i32>} : memref<1x12xf32, #tpu.memory_space<vmem>>, vector<1x12xf32>,
    %c0_23 = arith.constant 0 : index
    %c0_24 = arith.constant 0 : index
    %c0_25 = arith.constant 0 : index
    %43 = vector.load %arg4[%c0_23, %c0_24, %c0_25] : memref<1x1x12xf32, #tpu.memory_space<vmem>>, vector<1x1x12xf32>
    %44 = vector.shape_cast %43 : vector<1x1x12xf32> to vector<1x12xf32>
    %45 = vector.shape_cast %27 : vector<1x12xf32> to vector<1x1x12xf32>
    tpu.vector_store %arg4[%c0_23, %c0_24, %c0_25], %45 {strides = array<i32>} : memref<1x1x12xf32, #tpu.memory_space<vmem>>, vector<1x1x12xf32>,
    %c0_26 = arith.constant 0 : index
    %c0_27 = arith.constant 0 : index
    %46 = vector.load %arg5[%c0_26, %c0_27] : memref<1x12xf32, #tpu.memory_space<vmem>>, vector<1x12xf32>
    tpu.vector_store %arg5[%c0_26, %c0_27], %36 {strides = array<i32>} : memref<1x12xf32, #tpu.memory_space<vmem>>, vector<1x12xf32>,
    %c0_28 = arith.constant 0 : index
    %c0_29 = arith.constant 0 : index
    %47 = vector.load %arg6[%c0_28, %c0_29] : memref<1x12xf32, #tpu.memory_space<vmem>>, vector<1x12xf32>
    tpu.vector_store %arg6[%c0_28, %c0_29], %40 {strides = array<i32>} : memref<1x12xf32, #tpu.memory_space<vmem>>, vector<1x12xf32>,
    return
  }
  func.func @transform_0(%arg0: i32) -> (i32, i32, i32) {
    %c0_i32 = arith.constant 0 : i32
    %c0_i32_0 = arith.constant 0 : i32
    %c0_i32_1 = arith.constant 0 : i32
    return %arg0, %c0_i32, %c0_i32_0 : i32, i32, i32
  }
  func.func @transform_1(%arg0: i32) -> (i32, i32) {
    %c0_i32 = arith.constant 0 : i32
    %c0_i32_0 = arith.constant 0 : i32
    %c0_i32_1 = arith.constant 0 : i32
    return %c0_i32, %c0_i32_0 : i32, i32
  }
  func.func @transform_2(%arg0: i32) -> (i32, i32) {
    %c0_i32 = arith.constant 0 : i32
    %c0_i32_0 = arith.constant 0 : i32
    %c0_i32_1 = arith.constant 0 : i32
    return %c0_i32, %c0_i32_0 : i32, i32
  }
  func.func @transform_3(%arg0: i32) -> (i32, i32, i32) {
    %c0_i32 = arith.constant 0 : i32
    %c0_i32_0 = arith.constant 0 : i32
    %c0_i32_1 = arith.constant 0 : i32
    return %arg0, %c0_i32, %c0_i32_0 : i32, i32, i32
  }
  func.func @transform_4(%arg0: i32) -> (i32, i32) {
    %c0_i32 = arith.constant 0 : i32
    %c0_i32_0 = arith.constant 0 : i32
    %c0_i32_1 = arith.constant 0 : i32
    return %c0_i32, %c0_i32_0 : i32, i32
  }
  func.func @transform_5(%arg0: i32) -> (i32, i32) {
    %c0_i32 = arith.constant 0 : i32
    %c0_i32_0 = arith.constant 0 : i32
    %c0_i32_1 = arith.constant 0 : i32
    return %c0_i32, %c0_i32_0 : i32, i32
  }
}

</mosaic_0001>

<bundles_post_ra>
// kernel: tpu_custom_call.1
= control target key start
LH: loop header
LB: loop body
LE: loop exit
PB: predicated region body
PF: predicated region fallthrough
CT: control target
= control target key end

     0   :  { %11 = vsyncpa [#allocation5], 0  ;;  %s1187_s0 = inlined_call_operand.hbm [shape: f32[8,1,12], index: 0, kind: input, shape index: {}]   ;;  %s1188_s1 = inlined_call_operand.hbm [shape: f32[8,12], index: 1, kind: input, shape index: {}]   ;;  %s1189_s2 = inlined_call_operand.hbm [shape: f32[12,12], index: 2, kind: input, shape index: {}]   ;;  %s1190_s3 = inlined_call_operand.hbm [shape: f32[8,1,12], index: 3, kind: output, shape index: {0}]   ;;  %s1191_s4 = inlined_call_operand.hbm [shape: f32[1,12], index: 4, kind: output, shape index: {1}]   ;;  %s1192_s5 = inlined_call_operand.hbm [shape: f32[1,12], index: 5, kind: output, shape index: {2}]  }
   0x1   :  { %13 = vsyncpa [#allocation5 + $0x1], 0 }
   0x2   :  { %14 = vsyncpa [#allocation8], 0 }
   0x3   :  { %15 = vsyncpa [#allocation6], 0 }
   0x4   :  { %17 = vsyncpa [#allocation6 + $0x1], 0 }
   0x5   :  { %18 = vsyncpa [#allocation12], 0  ;;  %s906_s18 = smov 0   ;;  %s908_s19 = smov 0  }
   0x6   :  { %s910_s20 = smov 0   ;;  %s912_s21 = smov 0  }
   0x7 LB: > { %s927_s22 = sadd.s32 4294967295, %s862_s21   ;;  %s523_s23 = sadd.s32 4294967294, %s862_s21   ;;  %s862_s21 = sphi %s912_s21, %s1220_s21   ;;  %s858_s20 = sphi %s910_s20, %s1219_s20   ;;  %s854_s19 = sphi %s908_s19, %s1218_s19   ;;  %s850_s18 = sphi %s906_s18, %s1217_s18  }
   0x8   : > { %p44_p0 = scmp.ne.s32.totalorder %s854_s19, %s850_s18  ;;  %p1193_p1 = scmp.eq.s32.totalorder %s927_s22, 0 }
   0x9   : > { %p116_p3 = scmp.eq.s32.totalorder %s523_s23, 7  ;;  %p524_p5 = scmp.ge.s32.totalorder %s862_s21, 1 }
   0xa   : > { %p936_p4 = por %p1193_p1, %p44_p0  ;;  %p165_p7 = scmp.lt.s32.totalorder %s862_s21, 9 }
   0xb   : > { %p941_p6 = por %p116_p3, %p44_p0  ;;  %s864_s27 = smov [#allocation7]  }
   0xc   : > { %s1196_s24 = scalar_select %p936_p4, 1, 0 }
   0xd   : > { %s1197_s25 = scalar_select %p941_p6, 1, 0 }
   0xe   : > { %p947_p9 = pnand %p524_p5, %p165_p7  ;;  %s178_s28 = sshll.u32 %s864_s27, 4  ;;  %s179_s28 = int_to_ptr.vmem [resolvable:$true] %s178_s28 }
   0xf   : > { %s865_s29 = smov [#allocation9]   ;;  %s650_s9 = scalar_lea.hbm %s1188_s1, 128 }
  0x10   : > { %s1198_s26 = scalar_select %p947_p9, 1, 0 }
  0x11   : > { %p579_p10 = pneg %p947_p9  ;;  %s188_s30 = sshll.u32 %s865_s29, 4  ;;  %s959_s30 = int_to_ptr.vmem [resolvable:$true] %s188_s30 }
  0x12   : > { %p651_p12 = scmp.ne.s32.totalorder %s1188_s1, %s650_s9  ;;  %p657_p5 = scmp.lt.u32.totalorder %s650_s9, %s1188_s1 }
  0x13   : > { %p955_p11 = pnand %p579_p10, %p1193_p1 }
  0x15   : > { %p652_p13 = pneg %p955_p11 }
  0x17   : > { %p653_p0 = pnand %p652_p13, %p651_p12 }
  0x19   : > { %p654_p3 = pneg %p653_p0 }
  0x1b   : > { %p659_p7 = pnand %p657_p5, %p654_p3 }
  0x1d   : > { %662 = shalt.err (!%p659_p7)
}
  0x1e   : > { %s663_s14 = scalar_lea.vmem %s179_s28, 128  ;;  %p671_p2 = scmp.lt.s32.totalorder %s179_s28, %s179_s28 }
  0x1f   : > { %p664_p10 = scmp.ne.s32.totalorder %s179_s28, %s663_s14  ;;  %p672_p6 = scmp.lt.s32.totalorder %s663_s14, %s663_s14 }
  0x21   : > { %p666_p8 = pnand %p664_p10, %p652_p13  ;;  %p673_p4 = por %p672_p6, %p671_p2 }
  0x23   : > { %p667_p1 = pneg %p666_p8 }
  0x25   : > { %p674_p9 = pnand %p673_p4, %p667_p1 }
  0x27   : > { %677 = shalt.err (!%p674_p9)
}
  0x28   : > { %582 = dma.hbm_to_vmem [thread:$0]  (!%p955_p11), %s1188_s1, 128, %s179_s28, [#allocation8]  }
  0x29   : > { %s678_s27 = scalar_lea.hbm %s1189_s2, 256 }
  0x2a   : > { %p679_p8 = scmp.ne.s32.totalorder %s1189_s2, %s678_s27  ;;  %p685_p4 = scmp.lt.u32.totalorder %s678_s27, %s1189_s2 }
  0x2c   : > { %p681_p2 = pnand %p679_p8, %p652_p13 }
  0x2e   : > { %p682_p1 = pneg %p681_p2 }
  0x30   : > { %p687_p6 = pnand %p685_p4, %p682_p1 }
  0x32   : > { %690 = shalt.err (!%p687_p6)
}
  0x33   : > { %s691_s28 = scalar_lea.vmem %s959_s30, 256  ;;  %p699_p3 = scmp.lt.s32.totalorder %s959_s30, %s959_s30 }
  0x34   : > { %p692_p9 = scmp.ne.s32.totalorder %s959_s30, %s691_s28  ;;  %p700_p5 = scmp.lt.s32.totalorder %s691_s28, %s691_s28 }
  0x36   : > { %p694_p12 = pnand %p692_p9, %p652_p13  ;;  %p701_p7 = por %p700_p5, %p699_p3 }
  0x38   : > { %p695_p0 = pneg %p694_p12 }
  0x3a   : > { %p702_p10 = pnand %p701_p7, %p695_p0 }
  0x3c   : > { %705 = shalt.err (!%p702_p10)
}
  0x3d   : > { %s866_s10 = smov 128   ;;  %s867_s11 = smov 8  }
  0x3e   : > { %585 = dma.hbm_to_vmem [thread:$0]  (!%p955_p11), %s1189_s2, 256, %s959_s30, [#allocation8], %s866_s10, %s866_s10, %s867_s11  }
  0x3f   : > { %s1009_s14 = sadd.s32 1, %s862_s21   ;;  %s31_s15 = sadd.s32 1, %s858_s20 }
  0x40   : > { %s28_s16 = ssub.s32 %s862_s21, %s1009_s14  ;;  %p38_p13 = scmp.ne.s32.totalorder %s858_s20, %s854_s19 }
  0x41   : > { %p29_p8 = scmp.eq.s32.totalorder %s28_s16, 0  ;;  %p39_p2 = scmp.eq.s32.totalorder %s862_s21, 0 }
  0x42   : > { %p1200_p1 = scmp.eq.s32.totalorder %s927_s22, 7  ;;  %p596_p6 = scmp.lt.s32.totalorder %s862_s21, 8 }
  0x43   : > { %s1025_s23 = scalar_select %p29_p8, %s858_s20, %s31_s15  }
  0x44   : > { %p1019_p4 = por %p1200_p1, %p38_p13  ;;  %p40_p9 = por %p39_p2, %p38_p13 }
  0x45   : > { %s202_s6 = sand.u32 1, %s858_s20   ;;  %s528_s27 = sshll.u32 %s862_s21, 4 }
  0x46   : > { %s205_s30 = scalar_lea.vmem [#allocation4], %s202_s6  ;;  %s1032_s9 = scalar_lea.hbm %s1187_s0, %s528_s27 }
  0x47   : > { %s212_s29 = sshll.u32 %s205_s30, 4  ;;  %p1036_p11 = pnand %p596_p6, %p40_p9  ;;  %s1034_s29 = int_to_ptr.vmem [resolvable:$true] %s212_s29 }
  0x48   : > { %s203_s10 = scalar_lea.sflag [#allocation5], %s202_s6  ;;  %s706_s11 = scalar_lea.hbm %s1032_s9, 16 }
  0x49   : > { %p707_p12 = scmp.ne.s32.totalorder %s1032_s9, %s706_s11  ;;  %p708_p0 = pneg %p1036_p11 }
  0x4a   : > { %s711_s15 = scalar_lea.hbm %s1187_s0, 128  ;;  %p712_p7 = scmp.lt.u32.totalorder %s1032_s9, %s1187_s0 }
  0x4b   : > { %p709_p3 = pnand %p708_p0, %p707_p12  ;;  %p713_p10 = scmp.lt.u32.totalorder %s711_s15, %s706_s11 }
  0x4c   : > { %p715_p8 = scmp.lt.u32.totalorder %s706_s11, %s1032_s9 }
  0x4d   : > { %p710_p5 = pneg %p709_p3  ;;  %p714_p13 = por %p713_p10, %p712_p7 }
  0x4f   : > { %p716_p2 = por %p715_p8, %p714_p13 }
  0x51   : > { %p717_p1 = pnand %p716_p2, %p710_p5 }
  0x53   : > { %720 = shalt.err (!%p717_p1)
}
  0x54   : > { %s721_s6 = scalar_lea.vmem %s1034_s29, 16  ;;  %s868_s30 = smov [#allocation4]  }
  0x55   : > { %p722_p6 = scmp.ne.s32.totalorder %s1034_s29, %s721_s6  ;;  %s726_s7 = sshll.u32 %s868_s30, 4  ;;  %s727_s7 = int_to_ptr.vmem [resolvable:$false] %s726_s7 }
  0x56   : > { %s728_s8 = scalar_lea.vmem %s727_s7, 32  ;;  %p729_p3 = scmp.lt.s32.totalorder %s1034_s29, %s727_s7 }
  0x57   : > { %p724_p9 = pnand %p722_p6, %p708_p0  ;;  %p730_p7 = scmp.lt.s32.totalorder %s728_s8, %s721_s6 }
  0x59   : > { %p725_p12 = pneg %p724_p9  ;;  %p731_p10 = por %p730_p7, %p729_p3 }
  0x5b   : > { %p732_p13 = pnand %p731_p10, %p725_p12 }
  0x5d   : > { %735 = shalt.err (!%p732_p13)
}
  0x5e   : > { %589 = dma.hbm_to_vmem [thread:$0]  (!%p1036_p11), %s1032_s9, 16, %s1034_s29, %s203_s10  }
  0x5f   : > { %p1203_p5 = scmp.ne.s32.totalorder %s1198_s26, 0 }
  0x60   : > { %s1068_s11 = sand.u32 (!%p1203_p5), 1, %s854_s19   ;;  %p1204_p0 = scmp.ne.s32.totalorder (!%p1203_p5), %s1196_s24, 0 }
  0x61   : > { %221 = sbr.rel (%p1203_p5) target bundleno = 420 (0x1a4), region = 32  ;;  %s224_s12 = scalar_lea.sflag (!%p1203_p5), [#allocation5], %s1068_s11 }
  0x62   : > { %s226_s13 = scalar_lea.vmem (!%p1203_p5), [#allocation4], %s1068_s11 }
  0x68   : > { %833 = dma.done.wait (%p1204_p0), %s224_s12, 16  }
  0x69   : > { %835 = vsyncadd (%p1204_p0), %s224_s12, 4294967280  ;;  %p1205_p8 = scmp.eq.s32.totalorder %s927_s22, 0 }
  0x6b   : > { %837 = dma.done.wait (%p1205_p8), [#allocation8], 384   ;;  %p1206_p11 = pmov %p1205_p8 }
  0x6c   : > { %s254_s26 = scalar_lea.vmem [#allocation10], %s1068_s11  ;;  %p1207_p2 = scmp.ne.s32.totalorder %s927_s22, 0 }
  0x6d   : > { %839 = vsyncadd (%p1206_p11), [#allocation8], 4294966912  ;;  %v263_v0 = vld [vmem:[#allocation7 + $0x4] sm:$0x1] (!%p1207_p2)  ;;  %vm264_vm0 = vcmask (!%p1207_p2), 90112  }
  0x6e   : > { %262 = sbr.rel (%p1207_p2) target bundleno = 117 (0x75), region = 48  ;;  %v266_v1 = vld [vmem:[#allocation7 + $0x5] sm:$0x1] (!%p1207_p2)  ;;  %265 = vst.msk [vmem:[#allocation2] sm:$0x1] (!%p1207_p2), %vm264_vm0, %v263_v0 }
  0x6f   : > { %267 = vst.msk [vmem:[#allocation3] sm:$0x1] (!%p1207_p2), %vm264_vm0, %v266_v1 }
  0x75 PF: > { %v275_v2 = vld [vmem:[#allocation9] sm:$0xff]  ;;  %v276_v3 = vld [vmem:[#allocation9 + $0x8] sm:$0xf]  ;;  %vm282_vm1 = vcmask 1043456   ;;  %v869_v4 = vmov 0.0|0.0   ;;  %vm870_vm2 = vmmov 1  }
  0x76   : > { %555 = vmatprep.subr.bf16.mxu0 %v869_v4  ;;  %v556_v5 = vpack.c.bf16 %v276_v3, %v275_v2  ;;  %vm557_vm3 = vmpackc.low %vm282_vm1, %vm870_vm2  ;;  %vm871_vm4 = vmmov 0   ;;  %v872_v6 = vmov 0.0   ;;  %v273_v7 = vld [vmem:[#allocation3] sm:$0x1]  ;;  %vm278_vm5 = vcmask 97280   ;;  %s873_s24 = smov [#allocation11]  }
  0x77   : > { %552 = vmatprep.mubr.msk.f32.mxu0 %vm871_vm4, %v872_v6  ;;  %v274_v8 = vld [vmem:[%s226_s13] sm:$0x1]  ;;  %v268_v10 = vld [vmem:[#allocation7] sm:$0x1]  ;;  %v270_v12 = vld [vmem:[#allocation7 + $0x2] sm:$0x1] }
  0x78   : > { %558 = vmatpush3.bf16.msk.msra.mxu0 %vm557_vm3, %v556_v5  ;;  %v277_v9 = vmul.f32 0.9, %v274_v8  ;;  %v272_v11 = vld [vmem:[#allocation2] sm:$0x1]  ;;  %v271_v18 = vld [vmem:[#allocation7 + $0x3] sm:$0x1] }
  0x79   : > { %v356_v15 = vsub.f32 %v268_v10, %v272_v11  ;;  %v269_v19 = vld [vmem:[#allocation7 + $0x1] sm:$0x1]  ;;  %v375_v21 = vmul.f32 %v273_v7, %v271_v18  ;;  %s409_s29 = sshll.u32 %s873_s24, 4  ;;  %s874_s9 = smov [#allocation13]   ;;  %vm379_vm7 = vcmask 90112   ;;  %s410_s29 = int_to_ptr.vmem [resolvable:$true] %s409_s29 }
  0x7a   : > { %s420_s28 = sshll.u32 %s874_s9, 4  ;;  %s736_s10 = scalar_lea.vmem %s410_s29, 16  ;;  %s1083_s28 = int_to_ptr.vmem [resolvable:$true] %s420_s28 }
  0x7b   : > { %553 = vmatmul.mubr.msk.f32.vlgmr.msra.gmra.mrb[0].mxu0 %vm278_vm5, %v273_v7  ;;  %v376_v24 = vsub.f32 %v273_v7, %v375_v21  ;;  %p737_p1 = scmp.ne.s32.totalorder %s410_s29, %s736_s10  ;;  %p1208_p6 = scmp.eq.s32.totalorder %s927_s22, 7 }
  0x7c   : > { %s742_s15 = scalar_lea.vmem %s410_s29, 32  ;;  %p743_p3 = scmp.lt.s32.totalorder %s410_s29, %s410_s29 }
  0x7d   : > { %p738_p9 = pnand %p737_p1, %p1208_p6  ;;  %p744_p7 = scmp.lt.s32.totalorder %s742_s15, %s736_s10 }
  0x7f   : > { %p739_p12 = pneg %p738_p9  ;;  %p745_p10 = por %p744_p7, %p743_p3 }
  0x81   : > { %p746_p13 = pnand %p745_p10, %p739_p12 }
 0x14e   : > { %v352_v13 = vpop.f32.mrb[0].mxu0 }
 0x14f   : > { %v353_v14 = vadd.f32 %v352_v13, %v277_v9  ;;  %v554_v16 = vpop.f32.mrb[1].mxu0 }
 0x151   : > { %v357_v17 = vmul.f32 %v353_v14, %v270_v12 }
 0x153   : > { %v358_v20 = vadd.f32 %v357_v17, %v356_v15 }
 0x155   : > { %v359_v22 = vmul.f32 %v358_v20, %v269_v19 }
 0x157   : > { %v360_v23 = vadd.f32 %v359_v22, %v272_v11 }
 0x159   : > { %v535_v25 = vadd.f32 -30.0, %v360_v23  ;;  %vm368_vm6 = vcmp.ge.f32.partialorder %v360_v23, 30.0 }
 0x15a   : > { %v537_v26 = vsel %vm368_vm6, 1.0, %v872_v6 }
 0x15b   : > { %v536_v27 = vmul.f32 -1.442695, %v535_v25  ;;  %v371_v28 = vsub.f32 1.0, %v537_v26  ;;  %v372_v29 = vmul.f32 %v537_v26, %v268_v10 }
 0x15d   : > { %646 = vpow2.f32 %v536_v27  ;;  %v373_v30 = vmul.f32 %v371_v28, %v360_v23  ;;  %v377_v31 = vmul.f32 %v376_v24, %v371_v28 }
 0x15f   : > { %v374_v32 = vadd.f32 %v373_v30, %v372_v29  ;;  %v378_v33 = vadd.f32 %v537_v26, %v377_v31 }
 0x161   : > { %380 = vst.msk [vmem:[#allocation2] sm:$0x1] %vm379_vm7, %v374_v32  ;;  %383 = vst.msk [vmem:[#allocation11] sm:$0x1] %vm379_vm7, %v374_v32 }
 0x162   : > { %381 = vst.msk [vmem:[#allocation3] sm:$0x1] %vm379_vm7, %v378_v33  ;;  %384 = vst.msk [vmem:[#allocation13] sm:$0x1] %vm379_vm7, %v378_v33 }
 0x163   : > { %749 = shalt.err (!%p746_p13)
}
 0x164   : > { %s750_s6 = scalar_lea.hbm %s1191_s4, 16  ;;  %p1209_p0 = pmov %p1208_p6 }
 0x165   : > { %p751_p5 = scmp.ne.s32.totalorder %s1191_s4, %s750_s6  ;;  %p756_p2 = scmp.lt.u32.totalorder %s750_s6, %s1191_s4 }
 0x167   : > { %p752_p8 = pnand %p751_p5, %p1209_p0 }
 0x169   : > { %p753_p11 = pneg %p752_p8 }
 0x16b   : > { %p758_p1 = pnand %p756_p2, %p753_p11 }
 0x16d   : > { %761 = shalt.err (!%p758_p1)
}
 0x16e   : > { %p1210_p6 = pmov %p1209_p0  ;;  %s762_s9 = scalar_lea.vmem %s1083_s28, 16 }
 0x16f   : > { %p763_p9 = scmp.ne.s32.totalorder %s1083_s28, %s762_s9  ;;  %p1211_p12 = pmov %p1209_p0 }
 0x170   : > { %571 = dma.vmem_to_hbm [thread:$0]  (%p1210_p6), %s410_s29, 16, %s1191_s4, [#allocation12]  }
 0x171   : > { %p764_p3 = pnand %p763_p9, %p1211_p12  ;;  %s768_s10 = scalar_lea.vmem %s1083_s28, 32 }
 0x172   : > { %p769_p10 = scmp.lt.s32.totalorder %s1083_s28, %s1083_s28  ;;  %p770_p13 = scmp.lt.s32.totalorder %s768_s10, %s762_s9 }
 0x173   : > { %p765_p7 = pneg %p764_p3 }
 0x174   : > { %p771_p5 = por %p770_p13, %p769_p10 }
 0x176   : > { %p772_p0 = pnand %p771_p5, %p765_p7 }
 0x178   : > { %775 = shalt.err (!%p772_p0)
}
 0x179   : > { %s776_s27 = scalar_lea.hbm %s1192_s5, 16  ;;  %p1212_p11 = pmov %p1210_p6 }
 0x17a   : > { %p777_p8 = scmp.ne.s32.totalorder %s1192_s5, %s776_s27  ;;  %p782_p6 = scmp.lt.u32.totalorder %s776_s27, %s1192_s5 }
 0x17c   : > { %p778_p2 = pnand %p777_p8, %p1212_p11 }
 0x17e   : > { %p779_p1 = pneg %p778_p2 }
 0x180   : > { %p784_p9 = pnand %p782_p6, %p779_p1 }
 0x182   : > { %787 = shalt.err (!%p784_p9)
}
 0x183   : > { %p1213_p12 = pmov %p1212_p11  ;;  %v647_v34 = vpop.eup %646  ;;  %s538_s13 = sshll.u32 %s927_s22, 4 }
 0x184   : > { %v365_v35 = vadd.f32 1.0, %v647_v34  ;;  %s398_s24 = sshll.u32 %s254_s26, 4  ;;  %s1137_s15 = scalar_lea.hbm %s1190_s3, %s538_s13  ;;  %s1139_s24 = int_to_ptr.vmem [resolvable:$true] %s398_s24 }
 0x185   : > { %573 = dma.vmem_to_hbm [thread:$0]  (%p1213_p12), %s1083_s28, 16, %s1192_s5, [#allocation12]  }
 0x186   : > { %648 = vrcp.f32 %v365_v35  ;;  %s386_s28 = scalar_lea.sflag [#allocation6], %s1068_s11  ;;  %s788_s16 = scalar_lea.vmem %s1139_s24, 16 }
 0x187   : > { %p789_p3 = scmp.ne.s32.totalorder %s1139_s24, %s788_s16  ;;  %s875_s27 = smov [#allocation10]  }
 0x188   : > { %s792_s6 = sshll.u32 %s875_s27, 4  ;;  %s793_s6 = int_to_ptr.vmem [resolvable:$false] %s792_s6 }
 0x189   : > { %p790_p7 = pnand %p789_p3, %p1019_p4  ;;  %s794_s30 = scalar_lea.vmem %s793_s6, 32 }
 0x18a   : > { %p795_p13 = scmp.lt.s32.totalorder %s1139_s24, %s793_s6  ;;  %p796_p5 = scmp.lt.s32.totalorder %s794_s30, %s788_s16 }
 0x18b   : > { %p791_p10 = pneg %p790_p7 }
 0x18c   : > { %p797_p0 = por %p796_p5, %p795_p13 }
 0x18e   : > { %p798_p8 = pnand %p797_p0, %p791_p10 }
 0x190   : > { %v649_v36 = vpop.eup %648 }
 0x191   : > { %382 = vst.msk [vmem:[%s254_s26] sm:$0x1] %vm379_vm7, %v649_v36 }
 0x192   : > { %801 = shalt.err (!%p798_p8)
}
 0x193   : > { %s802_s11 = scalar_lea.hbm %s1137_s15, 16  ;;  %s806_s7 = scalar_lea.hbm %s1190_s3, 128 }
 0x194   : > { %p803_p11 = scmp.ne.s32.totalorder %s1137_s15, %s802_s11  ;;  %p807_p6 = scmp.lt.u32.totalorder %s1137_s15, %s1190_s3 }
 0x195   : > { %p808_p9 = scmp.lt.u32.totalorder %s806_s7, %s802_s11  ;;  %p810_p3 = scmp.lt.u32.totalorder %s802_s11, %s1137_s15 }
 0x196   : > { %p804_p2 = pnand %p803_p11, %p1019_p4 }
 0x197   : > { %p809_p12 = por %p808_p9, %p807_p6 }
 0x198   : > { %p805_p1 = pneg %p804_p2 }
 0x199   : > { %p811_p7 = por %p810_p3, %p809_p12 }
 0x19b   : > { %p812_p10 = pnand %p811_p7, %p805_p1 }
 0x19d   : > { %815 = shalt.err (!%p812_p10)
}
 0x19e   : > { %569 = dma.vmem_to_hbm [thread:$0]  (%p1019_p4), %s1139_s24, 16, %s1137_s15, %s386_s28  }
 0x19f   : > { %p1214_p13 = scmp.eq.s32.totalorder %s927_s22, 7 }
 0x1a1   : > { %841 = dma.done.wait (%p1214_p13), [#allocation12], 32   ;;  %p1215_p5 = pmov %p1214_p13 }
 0x1a3   : > { %843 = vsyncadd (%p1215_p5), [#allocation12], 4294967264 }
 0x1a4 PF: > { %p603_p0 = scmp.ge.s32.totalorder %s862_s21, 2  ;;  %s440_s13 = sand.u32 1, %s850_s18  }
 0x1a5   : > { %p1216_p8 = scmp.ne.s32.totalorder %s1197_s25, 0  ;;  %s441_s9 = scalar_lea.sflag [#allocation6], %s440_s13 }
 0x1a7   : > { %p591_p11 = pnand %p603_p0, %p1216_p8 }
 0x1a9   : > { %845 = dma.done.wait (!%p591_p11), %s441_s9, 16  }
 0x1aa   : > { %847 = vsyncadd (!%p591_p11), %s441_s9, 4294967280  ;;  %p21_p4 = scmp.ge.s32.totalorder %s1009_s14, 10   ;;  %s1217_s18 = smov %s854_s19 }
 0x1ab   : > { %s1218_s19 = smov %s858_s20  ;;  %s1219_s20 = smov %s1025_s23 }
 0x1ac   : > { %s1220_s21 = smov %s1009_s14  ;;  %23 = sbr.rel (!%p21_p4) target bundleno = 7 (0x7), region = 105 }
 0x1b3   :  { %445 = vsyncpa [#allocation5], 1 }
 0x1b4   :  { %447 = vsyncpa [#allocation5 + $0x1], 1 }
 0x1b5   :  { %448 = vsyncpa [#allocation8], 1 }
 0x1b6   :  { %449 = vsyncpa [#allocation6], 1 }
 0x1b7   :  { %451 = vsyncpa [#allocation6 + $0x1], 1 }
 0x1b8   :  { %452 = vsyncpa [#allocation12], 1 }

</bundles_post_ra>
